<compile_context>
chip_gen: v7x
topology: tpu7x:2x2x1
jax: 0.10.0
libtpu: 0.0.40
codegen_flags: <defaults>
</compile_context>

<pallas_src>
import functools
import math

import jax
import jax.numpy as jnp
from jax.experimental import pallas as pl
from jax.experimental.pallas import tpu as pltpu


def _round_up(x, m):
    return ((x + m - 1) // m) * m


def _tconv_kernel(xc_ref, xh_ref, w_ref, b_ref, o_ref, *, rows, bsz, cin, fuse_taps):
    """One (rows, tile_cout) output tile of the k=3, pad=1 temporal conv.

    xc_ref: (rows, cin)        rows [i*rows, (i+1)*rows) of the zero-padded,
                               time-major-flattened activations x_pad
    xh_ref: (halo_rows, cin)   rows starting at (i+1)*rows (look-ahead halo, >= 2*B rows)
    w_ref : (3*cin, tile_cout) fused taps [W_prev; W_cur; W_next], already (Cin, Cout)
    b_ref : (1, tile_cout)     bias (f32)
    o_ref : (rows, tile_cout)
    """
    xc = xc_ref[...]                                            # (rows, cin)
    # Sliding window over rows: [current tile | first 2*B rows of the next tile].
    win = jnp.concatenate([xc, xh_ref[: 2 * bsz]], axis=0)      # (rows + 2*bsz, cin)
    x_prev = xc                                                 # == win[0:rows]
    x_cur = win[bsz:bsz + rows]
    x_next = win[2 * bsz:2 * bsz + rows]

    if fuse_taps:
        # Small Cin: one MXU pass with K = 3*Cin instead of three passes with K = Cin.
        lhs = jnp.concatenate([x_prev, x_cur, x_next], axis=1)  # (rows, 3*cin)
        acc = jnp.dot(lhs, w_ref[...], preferred_element_type=jnp.float32)
    else:
        w = w_ref[...]
        acc = jnp.dot(x_prev, w[0:cin], preferred_element_type=jnp.float32)
        acc = acc + jnp.dot(x_cur, w[cin:2 * cin], preferred_element_type=jnp.float32)
        acc = acc + jnp.dot(x_next, w[2 * cin:3 * cin], preferred_element_type=jnp.float32)

    o_ref[...] = (acc + b_ref[...]).astype(o_ref.dtype)


def temporal_convolution(x, weight, bias, *, tile_rows=256, tile_cout=None,
                         vmem_budget_bytes=24 * 1024 * 1024):
    """Pallas TPU forward of TemporalConvolution.

    x: (T, B, Cin); weight: (Cout, Cin, 3) (PyTorch Conv1d layout); bias: (Cout,)
    Returns (T, B, Cout), matching conv1d(x.permute(1,2,0), k=3, pad=1).permute(2,0,1).
    """
    T, B, Cin = x.shape
    Cout = weight.shape[0]
    N = T * B
    dtype = x.dtype

    # Sublane granularity: bf16 blocks need 16-row multiples, f32 needs 8.
    sub = 16 if dtype == jnp.bfloat16 else 8
    halo_rows = _round_up(2 * B, sub)                 # look-ahead rows fetched per tile
    rows = _round_up(max(tile_rows, halo_rows), halo_rows)

    # Lane-dense output: pad Cout to a multiple of 128 and (optionally) tile it.
    cout_pad = _round_up(Cout, 128)
    if tile_cout is None:
        tile_cout = 256 if cout_pad % 256 == 0 else 128
    tile_cout = min(tile_cout, cout_pad)
    assert cout_pad % tile_cout == 0

    # Rough per-step VMEM estimate (double-buffered blocks + f32 accumulator/temps);
    # shrink the row tile until it fits -- matters on v7x (64 MiB physical VMEM).
    bpe = jnp.dtype(dtype).itemsize
    def _vmem_est(r):
        return (2 * (r + halo_rows) * Cin * bpe       # x tile + halo (double-buffered)
                + 2 * 3 * Cin * tile_cout * bpe       # fused weight
                + 2 * tile_cout * 4                   # bias
                + 2 * r * tile_cout * bpe             # output tile
                + r * max(3 * Cin, tile_cout) * 4     # in-kernel temporaries
                + r * tile_cout * 4)                  # f32 accumulator
    while rows > halo_rows and _vmem_est(rows) > vmem_budget_bytes:
        rows = max(halo_rows, _round_up(rows // 2, halo_rows))

    grid_rows = pl.cdiv(N, rows)
    padded_rows = grid_rows * rows
    total_rows = (grid_rows + 1) * rows               # room for the last tile's halo
    ratio = rows // halo_rows                         # exact: rows % halo_rows == 0

    # Zero-padded, time-major-flattened activations:
    #   x_pad[j] = x_flat[j - B] for B <= j < B + N, else 0
    # => for output row r: prev = x_pad[r], cur = x_pad[r + B], next = x_pad[r + 2B].
    xf = x.reshape(N, Cin)
    x_pad = jnp.pad(xf, ((B, total_rows - B - N), (0, 0)))

    # Fused taps: out[t] = x[t-1] @ W0 + x[t] @ W1 + x[t+1] @ W2 + b
    # Keep operands in x.dtype (bf16 stays bf16 -> native MXU); accumulate in f32.
    w_f = jnp.transpose(weight, (2, 1, 0)).reshape(3 * Cin, Cout)
    w_f = jnp.pad(w_f, ((0, 0), (0, cout_pad - Cout))).astype(dtype)
    b_f = jnp.pad(bias, (0, cout_pad - Cout)).reshape(1, cout_pad).astype(jnp.float32)

    fuse_taps = Cin < 128
    kernel = functools.partial(_tconv_kernel, rows=rows, bsz=B, cin=Cin,
                               fuse_taps=fuse_taps)

    out_flat = pl.pallas_call(
        kernel,
        out_shape=jax.ShapeDtypeStruct((padded_rows, cout_pad), dtype),
        grid_spec=pltpu.PrefetchScalarGridSpec(
            num_scalar_prefetch=0,
            grid=(grid_rows, cout_pad // tile_cout),   # row axis outer -> x fetched once
            in_specs=[
                # Current row tile of the padded activations.
                pl.BlockSpec((rows, Cin), lambda i, j: (i, 0)),
                # Small look-ahead halo block starting right after the current tile.
                pl.BlockSpec((halo_rows, Cin), lambda i, j: ((i + 1) * ratio, 0)),
                # Fused weights / bias: one block per Cout tile.
                pl.BlockSpec((3 * Cin, tile_cout), lambda i, j: (0, j)),
                pl.BlockSpec((1, tile_cout), lambda i, j: (0, j)),
            ],
            out_specs=pl.BlockSpec((rows, tile_cout), lambda i, j: (i, j)),
        ),
        compiler_params=pltpu.CompilerParams(
            dimension_semantics=("parallel", "parallel"),
        ),
    )(x_pad, x_pad, w_f, b_f)

    return out_flat[:N, :Cout].reshape(T, B, Cout)


def _reference_forward(x, weight, bias):
    # Pure-JAX reference mirroring the PyTorch module exactly.
    xb = jnp.transpose(x, (1, 2, 0))  # (B, Cin, T) == x.permute(1, 2, 0)
    out = jax.lax.conv_general_dilated(
        xb, weight, window_strides=(1,), padding=((1, 1),),
        dimension_numbers=("NCH", "OIH", "NCH"),
        precision=jax.lax.Precision.HIGHEST,
    )
    out = out + bias[None, :, None]
    return jnp.transpose(out, (2, 0, 1))  # (T, B, Cout) == .permute(2, 0, 1)


if __name__ == "__main__":
    key = jax.random.PRNGKey(0)

    def run_case(case_key, T, B, input_dim, hidden_dim, **kw):
        kx, kwt, kb = jax.random.split(case_key, 3)
        # nn.Conv1d default init: U(-1/sqrt(fan_in), +), fan_in = Cin * kernel_size.
        fan_in = input_dim * 3
        bound = 1.0 / math.sqrt(fan_in)
        weight = jax.random.uniform(kwt, (hidden_dim, input_dim, 3),
                                    minval=-bound, maxval=bound, dtype=jnp.float32)
        bias = jax.random.uniform(kb, (hidden_dim,),
                                  minval=-bound, maxval=bound, dtype=jnp.float32)
        x = jax.random.normal(kx, (T, B, input_dim), dtype=jnp.float32)

        out = jax.block_until_ready(temporal_convolution(x, weight, bias, **kw))
        ref = jax.block_until_ready(_reference_forward(x, weight, bias))
        assert out.shape == (T, B, hidden_dim)
        err = float(jnp.max(jnp.abs(out - ref)))
        assert jnp.allclose(out, ref, atol=1e-4, rtol=1e-4), f"mismatch, max|err|={err}"

    k1, k2 = jax.random.split(key)
    # Small shapes consistent with the module's forward: x is (seq, batch, input_dim).
    run_case(k1, T=8, B=2, input_dim=4, hidden_dim=32)
    # Multi-tile sanity check: several row tiles (halo crosses tiles) and two Cout tiles.
    run_case(k2, T=64, B=4, input_dim=24, hidden_dim=200, tile_rows=64, tile_cout=128)

    print("KERNEL_OK")
</pallas_src>

<mosaic_0001>
module attributes {stable_mosaic.version = 11 : i64} {
  func.func @_tconv_kernel(%arg0: i32, %arg1: i32, %arg2: memref<256x4xf32, #tpu.memory_space<vmem>>, %arg3: memref<8x4xf32, #tpu.memory_space<vmem>>, %arg4: memref<12x128xf32, #tpu.memory_space<vmem>>, %arg5: memref<1x128xf32, #tpu.memory_space<vmem>>, %arg6: memref<256x128xf32, #tpu.memory_space<vmem>>) attributes {dimension_semantics = [#tpu.dimension_semantics<parallel>, #tpu.dimension_semantics<parallel>], iteration_bounds = array<i64: 1, 1>, scalar_prefetch = 0 : i64, scratch_operands = 0 : i64, tpu.core_type = #tpu.core_type<tc>, window_params = [{transform_indices = @transform_0, window_bounds = array<i64: 256, 4>}, {transform_indices = @transform_1, window_bounds = array<i64: 8, 4>}, {transform_indices = @transform_2, window_bounds = array<i64: 12, 128>}, {transform_indices = @transform_3, window_bounds = array<i64: 1, 128>}, {transform_indices = @transform_4, window_bounds = array<i64: 256, 128>}]} {
    %c0 = arith.constant 0 : index
    %c0_0 = arith.constant 0 : index
    %0 = vector.load %arg2[%c0, %c0_0] : memref<256x4xf32, #tpu.memory_space<vmem>>, vector<256x4xf32>
    %c0_1 = arith.constant 0 : index
    %c0_2 = arith.constant 0 : index
    %1 = vector.load %arg3[%c0_1, %c0_2] : memref<8x4xf32, #tpu.memory_space<vmem>>, vector<4x4xf32>
    %2 = tpu.concatenate %0, %1 in 0 : vector<256x4xf32>, vector<4x4xf32> -> vector<260x4xf32>
    %3 = vector.extract_strided_slice %2 {offsets = [2, 0], sizes = [256, 4], strides = [1, 1]} : vector<260x4xf32> to vector<256x4xf32>
    %4 = vector.extract_strided_slice %2 {offsets = [4, 0], sizes = [256, 4], strides = [1, 1]} : vector<260x4xf32> to vector<256x4xf32>
    %5 = tpu.concatenate %0, %3, %4 in 1 : vector<256x4xf32>, vector<256x4xf32>, vector<256x4xf32> -> vector<256x12xf32>
    %c0_3 = arith.constant 0 : index
    %c0_4 = arith.constant 0 : index
    %6 = vector.load %arg4[%c0_3, %c0_4] : memref<12x128xf32, #tpu.memory_space<vmem>>, vector<12x128xf32>
    %cst = arith.constant dense<0.000000e+00> : vector<256x128xf32>
    %7 = tpu.matmul %5, %6, %cst {dimension_numbers = #tpu.dot_dimension_numbers<[1], [0], [0], [1], [0, 0, 1, 1], [], []>} : vector<256x12xf32>, vector<12x128xf32>, vector<256x128xf32> -> vector<256x128xf32>
    %c0_5 = arith.constant 0 : index
    %c0_6 = arith.constant 0 : index
    %8 = vector.load %arg5[%c0_5, %c0_6] : memref<1x128xf32, #tpu.memory_space<vmem>>, vector<1x128xf32>
    %9 = vector.broadcast %8 : vector<1x128xf32> to vector<256x128xf32>
    %10 = arith.addf %7, %9 : vector<256x128xf32>
    %c0_7 = arith.constant 0 : index
    %c0_8 = arith.constant 0 : index
    %11 = vector.load %arg6[%c0_7, %c0_8] : memref<256x128xf32, #tpu.memory_space<vmem>>, vector<256x128xf32>
    tpu.vector_store %arg6[%c0_7, %c0_8], %10 {strides = array<i32>} : memref<256x128xf32, #tpu.memory_space<vmem>>, vector<256x128xf32>,
    return
  }
  func.func @transform_0(%arg0: i32, %arg1: i32) -> (i32, i32) {
    %c0_i32 = arith.constant 0 : i32
    %c0_i32_0 = arith.constant 0 : i32
    return %arg0, %c0_i32 : i32, i32
  }
  func.func @transform_1(%arg0: i32, %arg1: i32) -> (i32, i32) {
    %c1_i32 = arith.constant 1 : i32
    %0 = arith.addi %arg0, %c1_i32 : i32
    %c32_i32 = arith.constant 32 : i32
    %1 = arith.muli %0, %c32_i32 : i32
    %c0_i32 = arith.constant 0 : i32
    %c0_i32_0 = arith.constant 0 : i32
    return %1, %c0_i32 : i32, i32
  }
  func.func @transform_2(%arg0: i32, %arg1: i32) -> (i32, i32) {
    %c0_i32 = arith.constant 0 : i32
    %c0_i32_0 = arith.constant 0 : i32
    return %c0_i32, %arg1 : i32, i32
  }
  func.func @transform_3(%arg0: i32, %arg1: i32) -> (i32, i32) {
    %c0_i32 = arith.constant 0 : i32
    %c0_i32_0 = arith.constant 0 : i32
    return %c0_i32, %arg1 : i32, i32
  }
  func.func @transform_4(%arg0: i32, %arg1: i32) -> (i32, i32) {
    %c0_i32 = arith.constant 0 : i32
    return %arg0, %arg1 : i32, i32
  }
}

</mosaic_0001>

<bundles_post_ra>
// kernel: tpu_custom_call.1
= control target key start
LH: loop header
LB: loop body
LE: loop exit
PB: predicated region body
PF: predicated region fallthrough
CT: control target
= control target key end

     0   :  { %vm106_vm0 = vcmask 1045504   ;;  %s1042_s27 = smov 4   ;;  %vm268_vm1 = vcmask 1043456   ;;  %s1043_s6 = smov 8   ;;  %s1634_s0 = inlined_call_operand.vmem [shape: f32[512,4], index: 0, kind: input, shape index: {}]   ;;  %s1635_s1 = inlined_call_operand.vmem [shape: f32[512,4], index: 1, kind: input, shape index: {}]   ;;  %s1636_s2 = inlined_call_operand.vmem [shape: f32[12,128], index: 2, kind: input, shape index: {}]   ;;  %s1637_s3 = inlined_call_operand.vmem [shape: f32[1,128], index: 3, kind: input, shape index: {}]   ;;  %s1638_s4 = inlined_call_operand.hbm [shape: f32[256,128], index: 4, kind: output, shape index: {}]  }
   0x1   :  { %v1075_v0 = vld [vmem:[%s1634_s0 + $0x8] sm:$0xff]  ;;  %v1080_v1 = vld [vmem:[%s1634_s0 + $0x10] sm:$0xff]  ;;  %v1085_v2 = vld [vmem:[%s1634_s0] sm:$0xff] }
   0x2   :  { %v108_v3 = vrot.slane %v1075_v0, 2  ;;  %v110_v4 = vrot.slane %v1080_v1, 2  ;;  %v107_v5 = vrot.slane %v1085_v2, 2  ;;  %v1093_v6 = vld [vmem:[%s1634_s0 + $0x88] sm:$0xff]  ;;  %v1098_v7 = vld [vmem:[%s1634_s0 + $0x90] sm:$0xff]  ;;  %v1103_v8 = vld [vmem:[%s1634_s0 + $0x80] sm:$0xff] }
   0x3   :  { %v140_v9 = vrot.slane %v1093_v6, 2  ;;  %v142_v10 = vrot.slane %v1098_v7, 2  ;;  %v138_v11 = vrot.slane %v1103_v8, 2  ;;  %v300_v14 = vrot.slane %v1103_v8, 4  ;;  %v1131_v24 = vld [vmem:[%s1634_s0 + $0x98] sm:$0xff]  ;;  %v1147_v30 = vld [vmem:[%s1634_s0 + $0xa0] sm:$0xff] }
   0x4   :  { %v111_v12 = vsel %vm106_vm0, %v108_v3, %v110_v4  ;;  %v109_v13 = vsel %vm106_vm0, %v107_v5, %v108_v3  ;;  %v302_v15 = vrot.slane %v1093_v6, 4  ;;  %v269_v18 = vrot.slane %v1085_v2, 4  ;;  %v1136_v25 = vld [vmem:[%s1634_s0 + $0x18] sm:$0xff]  ;;  %v1152_v31 = vld [vmem:[%s1634_s0 + $0x20] sm:$0xff] }
   0x5   :  { %174 = vrot.lane.b32.xlu1 %v111_v12, %s1042_s27  ;;  %172 = vrot.lane.b32.xlu0 %v109_v13, %s1042_s27  ;;  %v143_v16 = vsel %vm106_vm0, %v140_v9, %v142_v10  ;;  %v141_v17 = vsel %vm106_vm0, %v138_v11, %v140_v9  ;;  %v270_v19 = vrot.slane %v1075_v0, 4  ;;  %v304_v22 = vrot.slane %v1098_v7, 4 }
   0x6   :  { %v303_v20 = vsel %vm268_vm1, %v300_v14, %v302_v15  ;;  %v272_v23 = vrot.slane %v1080_v1, 4  ;;  %v144_v28 = vrot.slane %v1131_v24, 2  ;;  %v112_v29 = vrot.slane %v1136_v25, 2 }
   0x7   :  { %v271_v21 = vsel %vm268_vm1, %v269_v18, %v270_v19  ;;  %v305_v26 = vsel %vm268_vm1, %v302_v15, %v304_v22 }
   0x8   :  { %v273_v27 = vsel %vm268_vm1, %v270_v19, %v272_v23 }
   0x9   :  { %206 = vrot.lane.b32.xlu1 %v143_v16, %s1042_s27  ;;  %204 = vrot.lane.b32.xlu0 %v141_v17, %s1042_s27 }
   0xd   :  { %366 = vrot.lane.b32.xlu1 %v303_v20, %s1043_s6  ;;  %334 = vrot.lane.b32.xlu0 %v271_v21, %s1043_s6 }
   0xe   :  { %9 = vsyncpa [#allocation3], 0  ;;  %v145_v32 = vsel %vm106_vm0, %v142_v10, %v144_v28  ;;  %v113_v33 = vsel %vm106_vm0, %v110_v4, %v112_v29  ;;  %v146_v34 = vrot.slane %v1147_v30, 2  ;;  %v114_v35 = vrot.slane %v1152_v31, 2  ;;  %v1175_v44 = vld [vmem:[%s1634_s0 + $0xa8] sm:$0xff]  ;;  %v1185_v46 = vld [vmem:[%s1634_s0 + $0x78] sm:$0xff] }
   0xf   :  { %v306_v38 = vrot.slane %v1131_v24, 4  ;;  %v274_v39 = vrot.slane %v1136_v25, 4  ;;  %v308_v42 = vrot.slane %v1147_v30, 4  ;;  %v276_v43 = vrot.slane %v1152_v31, 4  ;;  %v1180_v45 = vld [vmem:[%s1634_s0 + $0x28] sm:$0xff]  ;;  %v1196_v51 = vld [vmem:[%s1634_s0 + $0xb0] sm:$0xff] }
  0x10   :  { %v147_v36 = vsel %vm106_vm0, %v144_v28, %v146_v34  ;;  %v115_v37 = vsel %vm106_vm0, %v112_v29, %v114_v35  ;;  %v148_v47 = vrot.slane %v1175_v44, 2  ;;  %v116_v50 = vrot.slane %v1180_v45, 2  ;;  %v496_v53 = vld [vmem:[%s1636_s2] sm:$0xff]  ;;  %v497_v54 = vld [vmem:[%s1636_s2 + $0x8] sm:$0xf]  ;;  %v1208_v55 = vld [vmem:[%s1634_s0 + $0x30] sm:$0xff] }
  0x11   :  { %368 = vrot.lane.b32.xlu1 %v305_v26, %s1043_s6  ;;  %336 = vrot.lane.b32.xlu0 %v273_v27, %s1043_s6  ;;  %v307_v40 = vsel %vm268_vm1, %v304_v22, %v306_v38  ;;  %v275_v41 = vsel %vm268_vm1, %v272_v23, %v274_v39  ;;  %v309_v48 = vsel %vm268_vm1, %v306_v38, %v308_v42  ;;  %v136_v52 = vrot.slane %v1185_v46, 2  ;;  %v1252_v15 = vld [vmem:[%s1634_s0 + $0x38] sm:$0xff]  ;;  %v1263_v20 = vld [vmem:[%s1634_s0 + $0xc0] sm:$0xff] }
  0x12   :  { %v277_v49 = vsel %vm268_vm1, %v274_v39, %v276_v43  ;;  %v150_v57 = vrot.slane %v1196_v51, 2  ;;  %v298_v58 = vrot.slane %v1185_v46, 4  ;;  %v1005_v59 = vpack.c.bf16 %v497_v54, %v496_v53  ;;  %v1268_v21 = vld [vmem:[%s1634_s0 + $0x40] sm:$0xff]  ;;  %v1291_v38 = vld [vmem:[%s1634_s0 + $0xc8] sm:$0xff] }
  0x13   :  { %v1215_v56 = vsel %vm106_vm0, %v136_v52, %v138_v11  ;;  %v149_v60 = vsel %vm106_vm0, %v146_v34, %v148_v47  ;;  %v117_v61 = vsel %vm106_vm0, %v114_v35, %v116_v50  ;;  %v118_v62 = vrot.slane %v1208_v55, 2  ;;  %v1296_v39 = vld [vmem:[%s1634_s0 + $0x48] sm:$0xff] }
  0x14   :  { %vm1044_vm2 = vmmov 1   ;;  %v1230_v63 = vsel %vm268_vm1, %v298_v58, %v300_v14  ;;  %v151_v3 = vsel %vm106_vm0, %v148_v47, %v150_v57  ;;  %v310_v5 = vrot.slane %v1175_v44, 4  ;;  %v1247_v14 = vld [vmem:[%s1634_s0 + $0xb8] sm:$0xff]  ;;  %v1307_v47 = vld [vmem:[%s1634_s0 + $0xd0] sm:$0xff] }
  0x15   :  { %208 = vrot.lane.b32.xlu1 %v145_v32, %s1042_s27  ;;  %176 = vrot.lane.b32.xlu0 %v113_v33, %s1042_s27  ;;  %vm1006_vm3 = vmpackc.low %vm268_vm1, %vm1044_vm2  ;;  %v119_v4 = vsel %vm106_vm0, %v116_v50, %v118_v62  ;;  %v278_v9 = vrot.slane %v1180_v45, 4  ;;  %v312_v12 = vrot.slane %v1196_v51, 4  ;;  %v280_v13 = vrot.slane %v1208_v55, 4 }
  0x16   :  { %1007 = vmatprep.subr.msk.bf16.mxu0 %vm1006_vm3, %v1005_v59  ;;  %1011 = vmatprep.subr.msk.bf16.mxu1 %vm1006_vm3, %v1005_v59  ;;  %v311_v10 = vsel %vm268_vm1, %v308_v42, %v310_v5  ;;  %v152_v18 = vrot.slane %v1247_v14, 2  ;;  %v120_v19 = vrot.slane %v1252_v15, 2  ;;  %v154_v26 = vrot.slane %v1263_v20, 2 }
  0x17   :  { %1010 = vmatpush3.bf16.msk.msra.mxu0 %vm1006_vm3, %v1005_v59  ;;  %1012 = vmatpush3.bf16.msk.msra.mxu1 %vm1006_vm3, %v1005_v59  ;;  %v279_v11 = vsel %vm268_vm1, %v276_v43, %v278_v9  ;;  %v313_v16 = vsel %vm268_vm1, %v310_v5, %v312_v12  ;;  %v281_v17 = vsel %vm268_vm1, %v278_v9, %v280_v13  ;;  %v122_v27 = vrot.slane %v1268_v21, 2  ;;  %v1335_v9 = vld [vmem:[%s1634_s0 + $0xd8] sm:$0xff] }
  0x18   :  { %v153_v22 = vsel %vm106_vm0, %v150_v57, %v152_v18  ;;  %v121_v23 = vsel %vm106_vm0, %v118_v62, %v120_v19  ;;  %v155_v28 = vsel %vm106_vm0, %v152_v18, %v154_v26  ;;  %v314_v32 = vrot.slane %v1247_v14, 4  ;;  %v1356_v18 = vld [vmem:[%s1634_s0 + $0x60] sm:$0xff] }
  0x19   :  { %210 = vrot.lane.b32.xlu1 %v147_v36, %s1042_s27  ;;  %178 = vrot.lane.b32.xlu0 %v115_v37, %s1042_s27  ;;  %v123_v29 = vsel %vm106_vm0, %v120_v19, %v122_v27  ;;  %v282_v33 = vrot.slane %v1252_v15, 4  ;;  %v316_v36 = vrot.slane %v1263_v20, 4  ;;  %v284_v37 = vrot.slane %v1268_v21, 4 }
  0x1a   :  { %v315_v34 = vsel %vm268_vm1, %v312_v12, %v314_v32  ;;  %v156_v42 = vrot.slane %v1291_v38, 2  ;;  %v124_v43 = vrot.slane %v1296_v39, 2  ;;  %v158_v53 = vrot.slane %v1307_v47, 2 }
  0x1b   :  { %v283_v35 = vsel %vm268_vm1, %v280_v13, %v282_v33  ;;  %v160_v13 = vrot.slane %v1335_v9, 2  ;;  %vm430_vm4 = vcmask 31744   ;;  %vm463_vm5 = vcmask 64512  }
  0x1c   :  { %v125_v50 = vsel %vm106_vm0, %v122_v27, %v124_v43  ;;  %v159_v57 = vsel %vm106_vm0, %v156_v42, %v158_v53  ;;  %vm505_vm6 = vcmask 97280  }
  0x1d   :  { %370 = vrot.lane.b32.xlu1 %v307_v40, %s1043_s6  ;;  %338 = vrot.lane.b32.xlu0 %v275_v41, %s1043_s6  ;;  %v317_v40 = vsel %vm268_vm1, %v314_v32, %v316_v36  ;;  %v285_v41 = vsel %vm268_vm1, %v282_v33, %v284_v37  ;;  %v161_v19 = vsel %vm106_vm0, %v158_v53, %v160_v13  ;;  %v1400_v53 = vld [vmem:[%s1634_s0 + $0x70] sm:$0xff] }
  0x21   :  { %372 = vrot.lane.b32.xlu1 %v309_v48, %s1043_s6  ;;  %340 = vrot.lane.b32.xlu0 %v277_v49, %s1043_s6  ;;  %v1312_v48 = vld [vmem:[%s1634_s0 + $0x50] sm:$0xff]  ;;  %v157_v49 = vsel %vm106_vm0, %v154_v26, %v156_v42  ;;  %v130_v26 = vrot.slane %v1356_v18, 2 }
  0x22   :  { %v126_v54 = vrot.slane %v1312_v48, 2  ;;  %v288_v5 = vrot.slane %v1312_v48, 4 }
  0x24   :  { %v127_v59 = vsel %vm106_vm0, %v124_v43, %v126_v54 }
  0x25   :  { %212 = vrot.lane.b32.xlu1 %v149_v60, %s1042_s27  ;;  %180 = vrot.lane.b32.xlu0 %v117_v61, %s1042_s27  ;;  %v318_v60 = vrot.slane %v1291_v38, 4  ;;  %v286_v61 = vrot.slane %v1296_v39, 4 }
  0x27   :  { %v319_v62 = vsel %vm268_vm1, %v316_v36, %v318_v60  ;;  %v289_v12 = vsel %vm268_vm1, %v286_v61, %v288_v5  ;;  %v292_v36 = vrot.slane %v1356_v18, 4 }
  0x29   :  { %214 = vrot.lane.b32.xlu1 %v151_v3, %s1042_s27  ;;  %182 = vrot.lane.b32.xlu0 %v119_v4, %s1042_s27  ;;  %v287_v3 = vsel %vm268_vm1, %v284_v37, %v286_v61  ;;  %v320_v4 = vrot.slane %v1307_v47, 4  ;;  %v1379_v37 = vld [vmem:[%s1634_s0 + $0xe8] sm:$0xff] }
  0x2a   :  { %v164_v43 = vrot.slane %v1379_v37, 2 }
  0x2d   :  { %374 = vrot.lane.b32.xlu1 %v311_v10, %s1043_s6  ;;  %342 = vrot.lane.b32.xlu0 %v279_v11, %s1043_s6  ;;  %v1340_v10 = vld [vmem:[%s1634_s0 + $0x58] sm:$0xff]  ;;  %v321_v11 = vsel %vm268_vm1, %v318_v60, %v320_v4  ;;  %v134_v60 = vrot.slane %v1400_v53, 2 }
  0x2e   :  { %v290_v32 = vrot.slane %v1340_v10, 4 }
  0x30   :  { %v293_v42 = vsel %vm268_vm1, %v290_v32, %v292_v36 }
  0x31   :  { %376 = vrot.lane.b32.xlu1 %v313_v16, %s1043_s6  ;;  %344 = vrot.lane.b32.xlu0 %v281_v17, %s1043_s6  ;;  %v128_v16 = vrot.slane %v1340_v10, 2  ;;  %v1351_v17 = vld [vmem:[%s1634_s0 + $0xe0] sm:$0xff] }
  0x35   :  { %216 = vrot.lane.b32.xlu1 %v153_v22, %s1042_s27  ;;  %184 = vrot.lane.b32.xlu0 %v121_v23, %s1042_s27  ;;  %v129_v22 = vsel %vm106_vm0, %v126_v54, %v128_v16  ;;  %v162_v23 = vrot.slane %v1351_v17, 2 }
  0x37   :  { %v163_v27 = vsel %vm106_vm0, %v160_v13, %v162_v23  ;;  %v165_v54 = vsel %vm106_vm0, %v162_v23, %v164_v43  ;;  %v296_v13 = vrot.slane %v1400_v53, 4 }
  0x39   :  { %218 = vrot.lane.b32.xlu1 %v155_v28, %s1042_s27  ;;  %186 = vrot.lane.b32.xlu0 %v123_v29, %s1042_s27  ;;  %v131_v28 = vsel %vm106_vm0, %v128_v16, %v130_v26  ;;  %v322_v29 = vrot.slane %v1335_v9, 4  ;;  %v1423_v16 = vld [vmem:[%s1634_s0 + $0xf8] sm:$0xff] }
  0x3a   :  { %v168_v23 = vrot.slane %v1423_v16, 2 }
  0x3b   :  { %v323_v33 = vsel %vm268_vm1, %v320_v4, %v322_v29 }
  0x3d   :  { %378 = vrot.lane.b32.xlu1 %v315_v34, %s1043_s6  ;;  %346 = vrot.lane.b32.xlu0 %v283_v35, %s1043_s6  ;;  %v291_v34 = vsel %vm268_vm1, %v288_v5, %v290_v32  ;;  %v324_v35 = vrot.slane %v1351_v17, 4 }
  0x41   :  { %380 = vrot.lane.b32.xlu1 %v317_v40, %s1043_s6  ;;  %348 = vrot.lane.b32.xlu0 %v285_v41, %s1043_s6  ;;  %v1384_v40 = vld [vmem:[%s1634_s0 + $0x68] sm:$0xff]  ;;  %v325_v41 = vsel %vm268_vm1, %v322_v29, %v324_v35 }
  0x42   :  { %v294_v4 = vrot.slane %v1384_v40, 4 }
  0x45   :  { %220 = vrot.lane.b32.xlu1 %v157_v49, %s1042_s27  ;;  %188 = vrot.lane.b32.xlu0 %v125_v50, %s1042_s27  ;;  %v132_v49 = vrot.slane %v1384_v40, 2  ;;  %v1395_v50 = vld [vmem:[%s1634_s0 + $0xf0] sm:$0xff] }
  0x49   :  { %222 = vrot.lane.b32.xlu1 %v159_v57, %s1042_s27  ;;  %190 = vrot.lane.b32.xlu0 %v127_v59, %s1042_s27  ;;  %v133_v57 = vsel %vm106_vm0, %v130_v26, %v132_v49  ;;  %v166_v59 = vrot.slane %v1395_v50, 2  ;;  %v884_v26 = vld [vmem:[%s1635_s1 + $0x100] sm:$0xf] }
  0x4a   :  { %v170_v29 = vrot.slane %v884_v26, 2 }
  0x4b   :  { %v167_v61 = vsel %vm106_vm0, %v164_v43, %v166_v59 }
  0x4c   :  { %v171_v32 = vsel %vm106_vm0, %v168_v23, %v170_v29 }
  0x4d   :  { %382 = vrot.lane.b32.xlu1 %v319_v62, %s1043_s6  ;;  %350 = vrot.lane.b32.xlu0 %v287_v3, %s1043_s6  ;;  %v135_v62 = vsel %vm106_vm0, %v132_v49, %v134_v60  ;;  %v326_v3 = vrot.slane %v1379_v37, 4 }
  0x4f   :  { %v327_v5 = vsel %vm268_vm1, %v324_v35, %v326_v3 }
  0x51   :  { %384 = vrot.lane.b32.xlu1 %v321_v11, %s1043_s6  ;;  %352 = vrot.lane.b32.xlu0 %v289_v12, %s1043_s6  ;;  %v295_v11 = vsel %vm268_vm1, %v292_v36, %v294_v4  ;;  %v328_v12 = vrot.slane %v1395_v50, 4 }
  0x55   :  { %224 = vrot.lane.b32.xlu1 %v161_v19, %s1042_s27  ;;  %192 = vrot.lane.b32.xlu0 %v129_v22, %s1042_s27  ;;  %v329_v19 = vsel %vm268_vm1, %v326_v3, %v328_v12  ;;  %v297_v22 = vsel %vm268_vm1, %v294_v4, %v296_v13 }
  0x59   :  { %226 = vrot.lane.b32.xlu1 %v163_v27, %s1042_s27  ;;  %194 = vrot.lane.b32.xlu0 %v131_v28, %s1042_s27  ;;  %v169_v27 = vsel %vm106_vm0, %v166_v59, %v168_v23  ;;  %v137_v28 = vsel %vm106_vm0, %v134_v60, %v136_v52  ;;  %v299_v52 = vsel %vm268_vm1, %v296_v13, %v298_v58 }
  0x5d   :  { %386 = vrot.lane.b32.xlu1 %v323_v33, %s1043_s6  ;;  %354 = vrot.lane.b32.xlu0 %v291_v34, %s1043_s6  ;;  %v330_v33 = vrot.slane %v1423_v16, 4 }
  0x5f   :  { %v331_v36 = vsel %vm268_vm1, %v328_v12, %v330_v33 }
  0x61   :  { %388 = vrot.lane.b32.xlu1 %v325_v41, %s1043_s6  ;;  %356 = vrot.lane.b32.xlu0 %v293_v42, %s1043_s6  ;;  %v332_v41 = vrot.slane %v884_v26, 4 }
  0x63   :  { %v333_v49 = vsel %vm268_vm1, %v330_v33, %v332_v41 }
  0x65   :  { %228 = vrot.lane.b32.xlu1 %v165_v54, %s1042_s27  ;;  %196 = vrot.lane.b32.xlu0 %v133_v57, %s1042_s27 }
  0x69   :  { %230 = vrot.lane.b32.xlu1 %v167_v61, %s1042_s27  ;;  %198 = vrot.lane.b32.xlu0 %v135_v62, %s1042_s27 }
  0x6d   :  { %390 = vrot.lane.b32.xlu1 %v327_v5, %s1043_s6  ;;  %358 = vrot.lane.b32.xlu0 %v295_v11, %s1043_s6 }
  0x71   :  { %392 = vrot.lane.b32.xlu1 %v329_v19, %s1043_s6  ;;  %360 = vrot.lane.b32.xlu0 %v297_v22, %s1043_s6 }
  0x75   :  { %232 = vrot.lane.b32.xlu1 %v169_v27, %s1042_s27  ;;  %200 = vrot.lane.b32.xlu0 %v137_v28, %s1042_s27 }
  0x77   :  { %v175_v34 = vpop.permute.xlu1 %174  ;;  %v173_v35 = vpop.permute.xlu0 %172 }
  0x79   :  { %234 = vrot.lane.b32.xlu1 %v171_v32, %s1042_s27  ;;  %202 = vrot.lane.b32.xlu0 %v1215_v56, %s1042_s27  ;;  %v431_v56 = vsel %vm430_vm4, %v1085_v2, %v173_v35  ;;  %v432_v2 = vsel %vm430_vm4, %v1075_v0, %v175_v34 }
  0x7b   :  { %v207_v42 = vpop.permute.xlu1 %206  ;;  %v205_v43 = vpop.permute.xlu0 %204 }
  0x7c   :  { %v447_v54 = vsel %vm430_vm4, %v1103_v8, %v205_v43  ;;  %v448_v8 = vsel %vm430_vm4, %v1093_v6, %v207_v42 }
  0x7d   :  { %394 = vrot.lane.b32.xlu1 %v331_v36, %s1043_s6  ;;  %362 = vrot.lane.b32.xlu0 %v299_v52, %s1043_s6 }
  0x7f   :  { %v367_v57 = vpop.permute.xlu1 %366  ;;  %v335_v59 = vpop.permute.xlu0 %334 }
  0x80   :  { %v464_v58 = vsel %vm463_vm5, %v431_v56, %v335_v59  ;;  %v480_v60 = vsel %vm463_vm5, %v447_v54, %v367_v57 }
  0x81   :  { %396 = vrot.lane.b32.xlu1 %v333_v49, %s1043_s6  ;;  %364 = vrot.lane.b32.xlu0 %v1230_v63, %s1043_s6 }
  0x82   :  { %957 = vmatprep.mubr.msk.f32.mxu0 %vm505_vm6, %v464_v58  ;;  %981 = vmatprep.mubr.msk.f32.mxu1 %vm505_vm6, %v480_v60 }
  0x83   :  { %v369_v61 = vpop.permute.xlu1 %368  ;;  %v337_v62 = vpop.permute.xlu0 %336 }
  0x84   :  { %v481_v3 = vsel %vm463_vm5, %v448_v8, %v369_v61  ;;  %v465_v4 = vsel %vm463_vm5, %v432_v2, %v337_v62 }
  0x85   :  { %958 = vmatmul.mubr.msk.f32.vlgmr.msra.gmra.mrb[0].mxu0 %vm505_vm6, %v465_v4  ;;  %982 = vmatmul.mubr.msk.f32.vlgmr.msra.gmra.mrb[0].mxu1 %vm505_vm6, %v481_v3 }
  0x87   :  { %v209_v63 = vpop.permute.xlu1 %208  ;;  %v177_v5 = vpop.permute.xlu0 %176 }
  0x88   :  { %v449_v0 = vsel %vm430_vm4, %v1098_v7, %v209_v63  ;;  %v433_v6 = vsel %vm430_vm4, %v1080_v1, %v177_v5 }
  0x8b   :  { %v211_v11 = vpop.permute.xlu1 %210  ;;  %v179_v12 = vpop.permute.xlu0 %178 }
  0x8c   :  { %v450_v26 = vsel %vm430_vm4, %v1131_v24, %v211_v11  ;;  %v434_v27 = vsel %vm430_vm4, %v1136_v25, %v179_v12 }
  0x8f   :  { %v371_v13 = vpop.permute.xlu1 %370  ;;  %v339_v19 = vpop.permute.xlu0 %338 }
  0x90   :  { %v482_v22 = vsel %vm463_vm5, %v449_v0, %v371_v13  ;;  %v466_v23 = vsel %vm463_vm5, %v433_v6, %v339_v19 }
  0x91   :  { %960 = vmatprep.mubr.msk.f32.mxu0 %vm505_vm6, %v466_v23  ;;  %984 = vmatprep.mubr.msk.f32.mxu1 %vm505_vm6, %v482_v22 }
  0x93   :  { %v373_v7 = vpop.permute.xlu1 %372  ;;  %v341_v28 = vpop.permute.xlu0 %340 }
  0x94   :  { %v483_v1 = vsel %vm463_vm5, %v450_v26, %v373_v7  ;;  %v467_v29 = vsel %vm463_vm5, %v434_v27, %v341_v28 }
  0x95   :  { %961 = vmatmul.mubr.msk.f32.gmra.mrb[2].mxu0 %vm505_vm6, %v467_v29  ;;  %985 = vmatmul.mubr.msk.f32.gmra.mrb[2].mxu1 %vm505_vm6, %v483_v1 }
  0x97   :  { %v213_v32 = vpop.permute.xlu1 %212  ;;  %v181_v33 = vpop.permute.xlu0 %180 }
  0x98   :  { %v451_v24 = vsel %vm430_vm4, %v1147_v30, %v213_v32  ;;  %v435_v25 = vsel %vm430_vm4, %v1152_v31, %v181_v33 }
  0x9b   :  { %v215_v34 = vpop.permute.xlu1 %214  ;;  %v183_v35 = vpop.permute.xlu0 %182 }
  0x9c   :  { %v452_v43 = vsel %vm430_vm4, %v1175_v44, %v215_v34  ;;  %v436_v49 = vsel %vm430_vm4, %v1180_v45, %v183_v35 }
  0x9f   :  { %v375_v36 = vpop.permute.xlu1 %374  ;;  %v343_v52 = vpop.permute.xlu0 %342 }
  0xa0   :  { %v484_v41 = vsel %vm463_vm5, %v451_v24, %v375_v36  ;;  %v468_v42 = vsel %vm463_vm5, %v435_v25, %v343_v52 }
  0xa1   :  { %963 = vmatprep.mubr.msk.f32.mxu0 %vm505_vm6, %v468_v42  ;;  %987 = vmatprep.mubr.msk.f32.mxu1 %vm505_vm6, %v484_v41 }
  0xa3   :  { %v377_v30 = vpop.permute.xlu1 %376  ;;  %v345_v56 = vpop.permute.xlu0 %344 }
  0xa4   :  { %v485_v31 = vsel %vm463_vm5, %v452_v43, %v377_v30  ;;  %v469_v54 = vsel %vm463_vm5, %v436_v49, %v345_v56 }
  0xa5   :  { %964 = vmatmul.mubr.msk.f32.gmra.mrb[4].mxu0 %vm505_vm6, %v469_v54  ;;  %988 = vmatmul.mubr.msk.f32.gmra.mrb[4].mxu1 %vm505_vm6, %v485_v31 }
  0xa7   :  { %v217_v57 = vpop.permute.xlu1 %216  ;;  %v185_v59 = vpop.permute.xlu0 %184 }
  0xa8   :  { %v453_v44 = vsel %vm430_vm4, %v1196_v51, %v217_v57  ;;  %v437_v45 = vsel %vm430_vm4, %v1208_v55, %v185_v59 }
  0xab   :  { %v219_v58 = vpop.permute.xlu1 %218  ;;  %v187_v60 = vpop.permute.xlu0 %186 }
  0xac   :  { %v454_v3 = vsel %vm430_vm4, %v1247_v14, %v219_v58  ;;  %v438_v4 = vsel %vm430_vm4, %v1252_v15, %v187_v60 }
  0xaf   :  { %v379_v2 = vpop.permute.xlu1 %378  ;;  %v347_v8 = vpop.permute.xlu0 %346 }
  0xb0   :  { %v486_v61 = vsel %vm463_vm5, %v453_v44, %v379_v2  ;;  %v470_v62 = vsel %vm463_vm5, %v437_v45, %v347_v8 }
  0xb1   :  { %966 = vmatprep.mubr.msk.f32.mxu0 %vm505_vm6, %v470_v62  ;;  %990 = vmatprep.mubr.msk.f32.mxu1 %vm505_vm6, %v486_v61 }
  0xb3   :  { %v381_v51 = vpop.permute.xlu1 %380  ;;  %v349_v63 = vpop.permute.xlu0 %348 }
  0xb4   :  { %v487_v55 = vsel %vm463_vm5, %v454_v3, %v381_v51  ;;  %v471_v5 = vsel %vm463_vm5, %v438_v4, %v349_v63 }
  0xb5   :  { %967 = vmatmul.mubr.msk.f32.gmra.mrb[6].mxu0 %vm505_vm6, %v471_v5  ;;  %991 = vmatmul.mubr.msk.f32.gmra.mrb[6].mxu1 %vm505_vm6, %v487_v55 }
  0xb7   :  { %v221_v11 = vpop.permute.xlu1 %220  ;;  %v189_v12 = vpop.permute.xlu0 %188 }
  0xb8   :  { %v455_v14 = vsel %vm430_vm4, %v1263_v20, %v221_v11  ;;  %v439_v15 = vsel %vm430_vm4, %v1268_v21, %v189_v12 }
  0xbb   :  { %v223_v0 = vpop.permute.xlu1 %222  ;;  %v191_v6 = vpop.permute.xlu0 %190 }
  0xbc   :  { %v456_v26 = vsel %vm430_vm4, %v1291_v38, %v223_v0  ;;  %v440_v27 = vsel %vm430_vm4, %v1296_v39, %v191_v6  ;;  %v1587_v0 = vld [vmem:[%s1637_s3] ss:$0 sm:$0xff]  ;;  %s1045_s3 = smov [#allocation2]  }
  0xbd   :  { %s867_s27 = sshll.u32 %s1045_s3, 4  ;;  %s868_s27 = int_to_ptr.vmem [resolvable:$true] %s867_s27 }
  0xbe   :  { %s1018_s11 = scalar_lea.vmem %s868_s27, 4096  ;;  %p1023_p1 = scmp.lt.s32.totalorder %s868_s27, %s868_s27 }
  0xbf   :  { %v383_v13 = vpop.permute.xlu1 %382  ;;  %v351_v19 = vpop.permute.xlu0 %350  ;;  %p1019_p0 = scmp.ne.s32.totalorder %s868_s27, %s1018_s11  ;;  %p1024_p2 = scmp.lt.s32.totalorder %s1018_s11, %s1018_s11 }
  0xc0   :  { %v488_v22 = vsel %vm463_vm5, %v455_v14, %v383_v13  ;;  %v472_v23 = vsel %vm463_vm5, %v439_v15, %v351_v19 }
  0xc1   :  { %969 = vmatprep.mubr.msk.f32.mxu0 %vm505_vm6, %v472_v23  ;;  %993 = vmatprep.mubr.msk.f32.mxu1 %vm505_vm6, %v488_v22  ;;  %p1025_p3 = por %p1024_p2, %p1023_p1 }
  0xc3   :  { %v385_v20 = vpop.permute.xlu1 %384  ;;  %v353_v7 = vpop.permute.xlu0 %352  ;;  %p1026_p4 = pnand %p1025_p3, %p1019_p0 }
  0xc4   :  { %v489_v21 = vsel %vm463_vm5, %v456_v26, %v385_v20  ;;  %v473_v28 = vsel %vm463_vm5, %v440_v27, %v353_v7 }
  0xc5   :  { %970 = vmatmul.mubr.msk.f32.gmra.mrb[8].mxu0 %vm505_vm6, %v473_v28  ;;  %994 = vmatmul.mubr.msk.f32.gmra.mrb[8].mxu1 %vm505_vm6, %v489_v21 }
  0xc7   :  { %v225_v1 = vpop.permute.xlu1 %224  ;;  %v193_v29 = vpop.permute.xlu0 %192 }
  0xc8   :  { %v457_v38 = vsel %vm430_vm4, %v1307_v47, %v225_v1  ;;  %v441_v39 = vsel %vm430_vm4, %v1312_v48, %v193_v29 }
  0xcb   :  { %v227_v32 = vpop.permute.xlu1 %226  ;;  %v195_v33 = vpop.permute.xlu0 %194 }
  0xcc   :  { %v458_v36 = vsel %vm430_vm4, %v1335_v9, %v227_v32  ;;  %v442_v52 = vsel %vm430_vm4, %v1340_v10, %v195_v33 }
  0xcf   :  { %v387_v34 = vpop.permute.xlu1 %386  ;;  %v355_v35 = vpop.permute.xlu0 %354 }
  0xd0   :  { %v490_v24 = vsel %vm463_vm5, %v457_v38, %v387_v34  ;;  %v474_v25 = vsel %vm463_vm5, %v441_v39, %v355_v35 }
  0xd1   :  { %972 = vmatprep.mubr.msk.f32.mxu0 %vm505_vm6, %v474_v25  ;;  %996 = vmatprep.mubr.msk.f32.mxu1 %vm505_vm6, %v490_v24 }
  0xd3   :  { %v389_v47 = vpop.permute.xlu1 %388  ;;  %v357_v41 = vpop.permute.xlu0 %356 }
  0xd4   :  { %v491_v48 = vsel %vm463_vm5, %v458_v36, %v389_v47  ;;  %v475_v42 = vsel %vm463_vm5, %v442_v52, %v357_v41 }
  0xd5   :  { %973 = vmatmul.mubr.msk.f32.gmra.mrb[10].mxu0 %vm505_vm6, %v475_v42  ;;  %997 = vmatmul.mubr.msk.f32.gmra.mrb[10].mxu1 %vm505_vm6, %v491_v48 }
  0xd7   :  { %v229_v43 = vpop.permute.xlu1 %228  ;;  %v197_v49 = vpop.permute.xlu0 %196 }
  0xd8   :  { %v459_v9 = vsel %vm430_vm4, %v1351_v17, %v229_v43  ;;  %v443_v10 = vsel %vm430_vm4, %v1356_v18, %v197_v49 }
  0xdb   :  { %v231_v30 = vpop.permute.xlu1 %230  ;;  %v199_v56 = vpop.permute.xlu0 %198 }
  0xdc   :  { %v460_v58 = vsel %vm430_vm4, %v1379_v37, %v231_v30  ;;  %v444_v60 = vsel %vm430_vm4, %v1384_v40, %v199_v56 }
  0xdf   :  { %v391_v31 = vpop.permute.xlu1 %390  ;;  %v359_v54 = vpop.permute.xlu0 %358 }
  0xe0   :  { %v492_v57 = vsel %vm463_vm5, %v459_v9, %v391_v31  ;;  %v476_v59 = vsel %vm463_vm5, %v443_v10, %v359_v54 }
  0xe1   :  { %975 = vmatprep.mubr.msk.f32.mxu0 %vm505_vm6, %v476_v59  ;;  %999 = vmatprep.mubr.msk.f32.mxu1 %vm505_vm6, %v492_v57 }
  0xe3   :  { %v393_v17 = vpop.permute.xlu1 %392  ;;  %v361_v44 = vpop.permute.xlu0 %360 }
  0xe4   :  { %v493_v18 = vsel %vm463_vm5, %v460_v58, %v393_v17  ;;  %v477_v45 = vsel %vm463_vm5, %v444_v60, %v361_v44 }
  0xe5   :  { %976 = vmatmul.mubr.msk.f32.gmra.mrb[12].mxu0 %vm505_vm6, %v477_v45  ;;  %1000 = vmatmul.mubr.msk.f32.gmra.mrb[12].mxu1 %vm505_vm6, %v493_v18 }
  0xe7   :  { %v233_v2 = vpop.permute.xlu1 %232  ;;  %v201_v8 = vpop.permute.xlu0 %200 }
  0xe8   :  { %v461_v37 = vsel %vm430_vm4, %v1395_v50, %v233_v2  ;;  %v445_v40 = vsel %vm430_vm4, %v1400_v53, %v201_v8 }
  0xeb   :  { %v235_v61 = vpop.permute.xlu1 %234  ;;  %v203_v62 = vpop.permute.xlu0 %202 }
  0xec   :  { %v462_v55 = vsel %vm430_vm4, %v1423_v16, %v235_v61  ;;  %v446_v5 = vsel %vm430_vm4, %v1185_v46, %v203_v62 }
  0xef   :  { %v395_v3 = vpop.permute.xlu1 %394  ;;  %v363_v4 = vpop.permute.xlu0 %362 }
  0xf0   :  { %v494_v51 = vsel %vm463_vm5, %v461_v37, %v395_v3  ;;  %v478_v63 = vsel %vm463_vm5, %v445_v40, %v363_v4 }
  0xf1   :  { %978 = vmatprep.mubr.msk.f32.mxu0 %vm505_vm6, %v478_v63  ;;  %1002 = vmatprep.mubr.msk.f32.mxu1 %vm505_vm6, %v494_v51 }
  0xf3   :  { %v397_v50 = vpop.permute.xlu1 %396  ;;  %v365_v11 = vpop.permute.xlu0 %364 }
  0xf4   :  { %v495_v53 = vsel %vm463_vm5, %v462_v55, %v397_v50  ;;  %v479_v12 = vsel %vm463_vm5, %v446_v5, %v365_v11 }
  0xf5   :  { %979 = vmatmul.mubr.msk.f32.gmra.mrb[14].mxu0 %vm505_vm6, %v479_v12  ;;  %1003 = vmatmul.mubr.msk.f32.gmra.mrb[14].mxu1 %vm505_vm6, %v495_v53 }
 0x158   :  { %v959_v6 = vpop.f32.mrb[0].mxu0  ;;  %v983_v16 = vpop.f32.mrb[0].mxu1 }
 0x159   :  { %v677_v14 = vadd.f32 %v959_v6, %v1587_v0  ;;  %v757_v46 = vadd.f32 %v983_v16, %v1587_v0  ;;  %v671_v15 = vpop.f32.mrb[1].mxu0  ;;  %v751_v13 = vpop.f32.mrb[1].mxu1 }
 0x15a   :  { %v672_v19 = vadd.f32 %v1587_v0, %v671_v15  ;;  %v752_v22 = vadd.f32 %v1587_v0, %v751_v13 }
 0x15b   :  { %831 = vst [vmem:[#allocation2 + $0x8] sm:$0xff] %v677_v14  ;;  %847 = vst [vmem:[#allocation2 + $0x88] sm:$0xff] %v757_v46 }
 0x15c   :  { %830 = vst [vmem:[#allocation2] sm:$0xff] %v672_v19  ;;  %846 = vst [vmem:[#allocation2 + $0x80] sm:$0xff] %v752_v22 }
 0x168   :  { %v962_v23 = vpop.f32.mrb[2].mxu0  ;;  %v986_v26 = vpop.f32.mrb[2].mxu1 }
 0x169   :  { %v687_v27 = vadd.f32 %v962_v23, %v1587_v0  ;;  %v767_v20 = vadd.f32 %v986_v26, %v1587_v0  ;;  %v681_v7 = vpop.f32.mrb[3].mxu0  ;;  %v761_v21 = vpop.f32.mrb[3].mxu1 }
 0x16a   :  { %v682_v28 = vadd.f32 %v1587_v0, %v681_v7  ;;  %v762_v1 = vadd.f32 %v1587_v0, %v761_v21 }
 0x16b   :  { %833 = vst [vmem:[#allocation2 + $0x18] sm:$0xff] %v687_v27  ;;  %849 = vst [vmem:[#allocation2 + $0x98] sm:$0xff] %v767_v20 }
 0x16c   :  { %832 = vst [vmem:[#allocation2 + $0x10] sm:$0xff] %v682_v28  ;;  %848 = vst [vmem:[#allocation2 + $0x90] sm:$0xff] %v762_v1 }
 0x178   :  { %v965_v29 = vpop.f32.mrb[4].mxu0  ;;  %v989_v32 = vpop.f32.mrb[4].mxu1 }
 0x179   :  { %v697_v33 = vadd.f32 %v965_v29, %v1587_v0  ;;  %v777_v38 = vadd.f32 %v989_v32, %v1587_v0  ;;  %v691_v39 = vpop.f32.mrb[5].mxu0  ;;  %v771_v34 = vpop.f32.mrb[5].mxu1 }
 0x17a   :  { %v692_v35 = vadd.f32 %v1587_v0, %v691_v39  ;;  %v772_v24 = vadd.f32 %v1587_v0, %v771_v34 }
 0x17b   :  { %835 = vst [vmem:[#allocation2 + $0x28] sm:$0xff] %v697_v33  ;;  %851 = vst [vmem:[#allocation2 + $0xa8] sm:$0xff] %v777_v38 }
 0x17c   :  { %834 = vst [vmem:[#allocation2 + $0x20] sm:$0xff] %v692_v35  ;;  %850 = vst [vmem:[#allocation2 + $0xa0] sm:$0xff] %v772_v24 }
 0x188   :  { %v968_v25 = vpop.f32.mrb[6].mxu0  ;;  %v992_v36 = vpop.f32.mrb[6].mxu1 }
 0x189   :  { %v707_v52 = vadd.f32 %v968_v25, %v1587_v0  ;;  %v787_v47 = vadd.f32 %v992_v36, %v1587_v0  ;;  %v701_v41 = vpop.f32.mrb[7].mxu0  ;;  %v781_v48 = vpop.f32.mrb[7].mxu1 }
 0x18a   :  { %v702_v42 = vadd.f32 %v1587_v0, %v701_v41  ;;  %v782_v43 = vadd.f32 %v1587_v0, %v781_v48 }
 0x18b   :  { %837 = vst [vmem:[#allocation2 + $0x38] sm:$0xff] %v707_v52  ;;  %853 = vst [vmem:[#allocation2 + $0xb8] sm:$0xff] %v787_v47 }
 0x18c   :  { %836 = vst [vmem:[#allocation2 + $0x30] sm:$0xff] %v702_v42  ;;  %852 = vst [vmem:[#allocation2 + $0xb0] sm:$0xff] %v782_v43 }
 0x198   :  { %v971_v49 = vpop.f32.mrb[8].mxu0  ;;  %v995_v30 = vpop.f32.mrb[8].mxu1 }
 0x199   :  { %v717_v56 = vadd.f32 %v971_v49, %v1587_v0  ;;  %v797_v9 = vadd.f32 %v995_v30, %v1587_v0  ;;  %v711_v10 = vpop.f32.mrb[9].mxu0  ;;  %v791_v31 = vpop.f32.mrb[9].mxu1 }
 0x19a   :  { %v712_v54 = vadd.f32 %v1587_v0, %v711_v10  ;;  %v792_v57 = vadd.f32 %v1587_v0, %v791_v31 }
 0x19b   :  { %839 = vst [vmem:[#allocation2 + $0x48] sm:$0xff] %v717_v56  ;;  %855 = vst [vmem:[#allocation2 + $0xc8] sm:$0xff] %v797_v9 }
 0x19c   :  { %838 = vst [vmem:[#allocation2 + $0x40] sm:$0xff] %v712_v54  ;;  %854 = vst [vmem:[#allocation2 + $0xc0] sm:$0xff] %v792_v57 }
 0x1a8   :  { %v974_v59 = vpop.f32.mrb[10].mxu0  ;;  %v998_v58 = vpop.f32.mrb[10].mxu1 }
 0x1a9   :  { %v727_v60 = vadd.f32 %v974_v59, %v1587_v0  ;;  %v807_v17 = vadd.f32 %v998_v58, %v1587_v0  ;;  %v721_v44 = vpop.f32.mrb[11].mxu0  ;;  %v801_v18 = vpop.f32.mrb[11].mxu1 }
 0x1aa   :  { %v722_v45 = vadd.f32 %v1587_v0, %v721_v44  ;;  %v802_v2 = vadd.f32 %v1587_v0, %v801_v18 }
 0x1ab   :  { %841 = vst [vmem:[#allocation2 + $0x58] sm:$0xff] %v727_v60  ;;  %857 = vst [vmem:[#allocation2 + $0xd8] sm:$0xff] %v807_v17 }
 0x1ac   :  { %840 = vst [vmem:[#allocation2 + $0x50] sm:$0xff] %v722_v45  ;;  %856 = vst [vmem:[#allocation2 + $0xd0] sm:$0xff] %v802_v2 }
 0x1b8   :  { %v977_v8 = vpop.f32.mrb[12].mxu0  ;;  %v1001_v61 = vpop.f32.mrb[12].mxu1 }
 0x1b9   :  { %v737_v62 = vadd.f32 %v977_v8, %v1587_v0  ;;  %v817_v37 = vadd.f32 %v1001_v61, %v1587_v0  ;;  %v731_v40 = vpop.f32.mrb[13].mxu0  ;;  %v811_v3 = vpop.f32.mrb[13].mxu1 }
 0x1ba   :  { %v732_v4 = vadd.f32 %v1587_v0, %v731_v40  ;;  %v812_v51 = vadd.f32 %v1587_v0, %v811_v3 }
 0x1bb   :  { %843 = vst [vmem:[#allocation2 + $0x68] sm:$0xff] %v737_v62  ;;  %859 = vst [vmem:[#allocation2 + $0xe8] sm:$0xff] %v817_v37 }
 0x1bc   :  { %842 = vst [vmem:[#allocation2 + $0x60] sm:$0xff] %v732_v4  ;;  %858 = vst [vmem:[#allocation2 + $0xe0] sm:$0xff] %v812_v51 }
 0x1c8   :  { %v980_v63 = vpop.f32.mrb[14].mxu0  ;;  %v1004_v55 = vpop.f32.mrb[14].mxu1 }
 0x1c9   :  { %v747_v5 = vadd.f32 %v980_v63, %v1587_v0  ;;  %v827_v50 = vadd.f32 %v1004_v55, %v1587_v0  ;;  %v741_v11 = vpop.f32.mrb[15].mxu0  ;;  %v821_v53 = vpop.f32.mrb[15].mxu1 }
 0x1ca   :  { %v742_v12 = vadd.f32 %v1587_v0, %v741_v11  ;;  %v822_v6 = vadd.f32 %v1587_v0, %v821_v53 }
 0x1cb   :  { %845 = vst [vmem:[#allocation2 + $0x78] sm:$0xff] %v747_v5  ;;  %861 = vst [vmem:[#allocation2 + $0xf8] sm:$0xff] %v827_v50 }
 0x1cc   :  { %844 = vst [vmem:[#allocation2 + $0x70] sm:$0xff] %v742_v12  ;;  %860 = vst [vmem:[#allocation2 + $0xf0] sm:$0xff] %v822_v6 }
 0x1cd   :  { %1029 = shalt.err (!%p1026_p4)
}
 0x1ce   :  { %s1030_s14 = scalar_lea.hbm %s1638_s4, 4096 }
 0x1cf   :  { %p1031_p5 = scmp.ne.s32.totalorder %s1638_s4, %s1030_s14  ;;  %p1034_p6 = scmp.lt.u32.totalorder %s1030_s14, %s1638_s4 }
 0x1d1   :  { %p1036_p7 = pnand %p1034_p6, %p1031_p5 }
 0x1d3   :  { %1039 = shalt.err (!%p1036_p7)
}
 0x1d4   :  { %s1046_s19 = smov 128  }
 0x1d5   :  { %873 = dma.vmem_to_hbm [thread:$0]  %s868_s27, 4096, %s1638_s4, [#allocation3], %s1046_s19, %s1046_s19, %s1043_s6  }
 0x1d6   :  { %1040 = dma.done.wait [#allocation3], 4096  }
 0x1d7   :  { %1041 = vsyncadd [#allocation3], 4294963200 }
 0x1d8   :  { %877 = vsyncpa [#allocation3], 1 }

</bundles_post_ra>
